<compile_context>
chip_gen: v5e
topology: v5e:2x2
jax: 0.10.0
libtpu: 0.0.40
codegen_flags: <defaults>
</compile_context>

<pallas_src>
import jax
import jax.numpy as jnp
from jax.experimental import pallas as pl
from jax.experimental.pallas import tpu as pltpu


# --------------------------------------------------------------------------
# One-time parameter packing (hoists transposes out of the per-call path).
# --------------------------------------------------------------------------
def prepare_params(params, input_size, hidden_size):
    """Pack PyTorch-convention (out_features, in_features) weights once."""
    I, H = input_size, hidden_size
    wxh = params["wxh_w"].T                                   # (I, H)
    whh = params["whh_w"].T                                   # (H, H)
    return {
        "wxh": wxh,                                           # (I, H)
        "whh": whh,                                           # (H, H)
        "w_in": jnp.concatenate([wxh, whh], axis=0),          # (I+H, H)
        "b_in": (params["wxh_b"] + params["whh_b"]).reshape(1, H),
        "w_out": params["lin_w"].T,                           # (H, I)
        "b_out": params["lin_b"].reshape(1, I),
    }


# --------------------------------------------------------------------------
# Single-step kernel (matches the module forward exactly).
# --------------------------------------------------------------------------
def _rnn_step_kernel(xh_ref, w_in_ref, b_in_ref, w_out_ref, b_out_ref,
                     outhid_ref):
    # xh_ref: (B, I+H)  w_in_ref: (I+H, H)  b_in_ref: (1, H)
    # w_out_ref: (H, I) b_out_ref: (1, I)   outhid_ref: (B, I+H)
    xh = xh_ref[...]
    hidden = jnp.tanh(
        jnp.dot(xh, w_in_ref[...], preferred_element_type=jnp.float32)
        + b_in_ref[...])
    out = (jnp.dot(hidden.astype(w_out_ref.dtype), w_out_ref[...],
                   preferred_element_type=jnp.float32)
           + b_out_ref[...])
    # Pack [output | hidden] into a single lane-contiguous slab -> one store.
    outhid_ref[...] = jnp.concatenate([out, hidden], axis=1).astype(
        outhid_ref.dtype)


@jax.jit
def rnn_block_forward(x, h, packed):
    """Single-step forward: returns (output, hidden) like the PyTorch module."""
    B, I = x.shape
    H = h.shape[1]
    xh = jnp.concatenate([x, h], axis=1)                      # (B, I+H)

    full = lambda shape: pl.BlockSpec(shape, lambda: (0,) * len(shape))
    slab = pl.pallas_call(
        _rnn_step_kernel,
        out_shape=jax.ShapeDtypeStruct((B, I + H), x.dtype),
        grid=(),
        in_specs=[
            full((B, I + H)),
            full((I + H, H)), full((1, H)),
            full((H, I)), full((1, I)),
        ],
        out_specs=full((B, I + H)),
    )(xh, packed["w_in"], packed["b_in"], packed["w_out"], packed["b_out"])
    return slab[:, :I], slab[:, I:]


# --------------------------------------------------------------------------
# Fused time-loop kernel: whole sequence in one pallas_call.
# --------------------------------------------------------------------------
def _rnn_seq_kernel(x_ref, h0_ref, wxh_ref, whh_ref, b_in_ref,
                    w_out_ref, b_out_ref, out_ref, hid_ref, h_scr):
    # x_ref: (1, B, I) block at timestep t   h0_ref: (B, H) resident
    # weights/biases: resident                out_ref: (1, B, I) block at t
    # hid_ref: (B, H) resident accumulator    h_scr: VMEM (B, H) f32 state
    t = pl.program_id(0)

    @pl.when(t == 0)
    def _():
        h_scr[...] = h0_ref[...].astype(jnp.float32)

    x = x_ref[0]                                              # (B, I)
    h = h_scr[...]                                            # (B, H) f32
    hidden = jnp.tanh(
        jnp.dot(x, wxh_ref[...], preferred_element_type=jnp.float32)
        + jnp.dot(h, whh_ref[...], preferred_element_type=jnp.float32)
        + b_in_ref[...])
    h_scr[...] = hidden

    out_ref[0] = (jnp.dot(hidden.astype(w_out_ref.dtype), w_out_ref[...],
                          preferred_element_type=jnp.float32)
                  + b_out_ref[...]).astype(out_ref.dtype)
    hid_ref[...] = hidden.astype(hid_ref.dtype)


@jax.jit
def rnn_sequence_forward(xs, h0, packed):
    """Apply the RNN cell over xs: (T, B, I) -> (outputs (T, B, I), h_T (B, H))."""
    T, B, I = xs.shape
    H = h0.shape[1]

    grid_spec = pltpu.PrefetchScalarGridSpec(
        num_scalar_prefetch=0,
        grid=(T,),
        in_specs=[
            pl.BlockSpec((1, B, I), lambda t: (t, 0, 0)),     # x_t streamed
            pl.BlockSpec((B, H), lambda t: (0, 0)),           # h0 (resident)
            pl.BlockSpec((I, H), lambda t: (0, 0)),           # Wxh (resident)
            pl.BlockSpec((H, H), lambda t: (0, 0)),           # Whh (resident)
            pl.BlockSpec((1, H), lambda t: (0, 0)),           # b_in (resident)
            pl.BlockSpec((H, I), lambda t: (0, 0)),           # Wo  (resident)
            pl.BlockSpec((1, I), lambda t: (0, 0)),           # bo  (resident)
        ],
        out_specs=(
            pl.BlockSpec((1, B, I), lambda t: (t, 0, 0)),     # out_t streamed
            pl.BlockSpec((B, H), lambda t: (0, 0)),           # final hidden
        ),
        scratch_shapes=[pltpu.VMEM((B, H), jnp.float32)],     # recurrent state
    )
    outs, hid = pl.pallas_call(
        _rnn_seq_kernel,
        out_shape=(jax.ShapeDtypeStruct((T, B, I), xs.dtype),
                   jax.ShapeDtypeStruct((B, H), xs.dtype)),
        grid_spec=grid_spec,
        compiler_params=pltpu.CompilerParams(
            dimension_semantics=("arbitrary",)),
    )(xs, h0, packed["wxh"], packed["whh"], packed["b_in"],
      packed["w_out"], packed["b_out"])
    return outs, hid


# --------------------------------------------------------------------------
# Pure-JAX references (mirror the PyTorch module exactly).
# --------------------------------------------------------------------------
def reference_forward(x, h, params):
    hidden = jnp.tanh(x @ params["wxh_w"].T + params["wxh_b"]
                      + h @ params["whh_w"].T + params["whh_b"])
    output = hidden @ params["lin_w"].T + params["lin_b"]
    return output, hidden


def reference_sequence(xs, h0, params):
    h = h0
    outs = []
    for t in range(xs.shape[0]):
        o, h = reference_forward(xs[t], h, params)
        outs.append(o)
    return jnp.stack(outs, axis=0), h


if __name__ == "__main__":
    key = jax.random.PRNGKey(0)
    B, I, H, T = 8, 16, 32, 12   # batch, input_size, hidden_size, seq_len

    k = jax.random.split(key, 9)
    params = {
        "wxh_w": jax.random.normal(k[0], (H, I), jnp.float32) * 0.1,
        "wxh_b": jax.random.normal(k[1], (H,), jnp.float32) * 0.1,
        "whh_w": jax.random.normal(k[2], (H, H), jnp.float32) * 0.1,
        "whh_b": jax.random.normal(k[3], (H,), jnp.float32) * 0.1,
        "lin_w": jax.random.normal(k[4], (I, H), jnp.float32) * 0.1,
        "lin_b": jax.random.normal(k[5], (I,), jnp.float32) * 0.1,
    }
    x = jax.random.normal(k[6], (B, I), jnp.float32)
    h = jax.random.normal(k[7], (B, H), jnp.float32)
    xs = jax.random.normal(k[8], (T, B, I), jnp.float32)

    packed = prepare_params(params, I, H)          # one-time weight packing

    # --- single-step forward (module semantics) ---
    out, hidden = jax.block_until_ready(rnn_block_forward(x, h, packed))
    ref_out, ref_hidden = reference_forward(x, h, params)
    assert out.shape == (B, I) and hidden.shape == (B, H)
    assert jnp.allclose(out, ref_out, atol=2e-5, rtol=2e-5)
    assert jnp.allclose(hidden, ref_hidden, atol=2e-5, rtol=2e-5)

    # --- fused time-loop forward (same cell applied T times in one kernel) ---
    outs, h_T = jax.block_until_ready(rnn_sequence_forward(xs, h, packed))
    ref_outs, ref_h_T = reference_sequence(xs, h, params)
    assert outs.shape == (T, B, I) and h_T.shape == (B, H)
    assert jnp.allclose(outs, ref_outs, atol=1e-4, rtol=1e-4)
    assert jnp.allclose(h_T, ref_h_T, atol=1e-4, rtol=1e-4)

    print("KERNEL_OK")
</pallas_src>

<mosaic_0001>
module attributes {stable_mosaic.version = 11 : i64} {
  func.func @_rnn_step_kernel(%arg0: memref<8x48xf32, #tpu.memory_space<vmem>>, %arg1: memref<48x32xf32, #tpu.memory_space<vmem>>, %arg2: memref<1x32xf32, #tpu.memory_space<vmem>>, %arg3: memref<32x16xf32, #tpu.memory_space<vmem>>, %arg4: memref<1x16xf32, #tpu.memory_space<vmem>>, %arg5: memref<8x48xf32, #tpu.memory_space<vmem>>) attributes {dimension_semantics = [], scalar_prefetch = 0 : i64, scratch_operands = 0 : i64, tpu.core_type = #tpu.core_type<tc>} {
    %c0 = arith.constant 0 : index
    %c0_0 = arith.constant 0 : index
    %0 = vector.load %arg0[%c0, %c0_0] : memref<8x48xf32, #tpu.memory_space<vmem>>, vector<8x48xf32>
    %c0_1 = arith.constant 0 : index
    %c0_2 = arith.constant 0 : index
    %1 = vector.load %arg1[%c0_1, %c0_2] : memref<48x32xf32, #tpu.memory_space<vmem>>, vector<48x32xf32>
    %cst = arith.constant dense<0.000000e+00> : vector<8x32xf32>
    %2 = tpu.matmul %0, %1, %cst {dimension_numbers = #tpu.dot_dimension_numbers<[1], [0], [0], [1], [0, 0, 1, 1], [], []>} : vector<8x48xf32>, vector<48x32xf32>, vector<8x32xf32> -> vector<8x32xf32>
    %c0_3 = arith.constant 0 : index
    %c0_4 = arith.constant 0 : index
    %3 = vector.load %arg2[%c0_3, %c0_4] : memref<1x32xf32, #tpu.memory_space<vmem>>, vector<1x32xf32>
    %4 = vector.broadcast %3 : vector<1x32xf32> to vector<8x32xf32>
    %5 = arith.addf %2, %4 : vector<8x32xf32>
    %6 = math.tanh %5 : vector<8x32xf32>
    %c0_5 = arith.constant 0 : index
    %c0_6 = arith.constant 0 : index
    %7 = vector.load %arg3[%c0_5, %c0_6] : memref<32x16xf32, #tpu.memory_space<vmem>>, vector<32x16xf32>
    %cst_7 = arith.constant dense<0.000000e+00> : vector<8x16xf32>
    %8 = tpu.matmul %6, %7, %cst_7 {dimension_numbers = #tpu.dot_dimension_numbers<[1], [0], [0], [1], [0, 0, 1, 1], [], []>} : vector<8x32xf32>, vector<32x16xf32>, vector<8x16xf32> -> vector<8x16xf32>
    %c0_8 = arith.constant 0 : index
    %c0_9 = arith.constant 0 : index
    %9 = vector.load %arg4[%c0_8, %c0_9] : memref<1x16xf32, #tpu.memory_space<vmem>>, vector<1x16xf32>
    %10 = vector.broadcast %9 : vector<1x16xf32> to vector<8x16xf32>
    %11 = arith.addf %8, %10 : vector<8x16xf32>
    %12 = tpu.concatenate %11, %6 in 1 : vector<8x16xf32>, vector<8x32xf32> -> vector<8x48xf32>
    %c0_10 = arith.constant 0 : index
    %c0_11 = arith.constant 0 : index
    %13 = vector.load %arg5[%c0_10, %c0_11] : memref<8x48xf32, #tpu.memory_space<vmem>>, vector<8x48xf32>
    tpu.vector_store %arg5[%c0_10, %c0_11], %12 {strides = array<i32>} : memref<8x48xf32, #tpu.memory_space<vmem>>, vector<8x48xf32>,
    return
  }
}

</mosaic_0001>

<bundles_post_ra>
// kernel: rnn_block_forward.1
= control target key start
LH: loop header
LB: loop body
LE: loop exit
PB: predicated region body
PF: predicated region fallthrough
CT: control target
= control target key end

     0   :  { %vm31_vm0 = vcmask 392192   ;;  %vm64_vm1 = vcmask 261120   ;;  %s105_s15 = smov 16   ;;  %vm91_vm2 = vcmask 130048   ;;  %s180_s1 = inlined_call_operand.vmem [shape: f32[48,32], index: 1, kind: input, shape index: {}]   ;;  %s181_s2 = inlined_call_operand.vmem [shape: f32[1,32], index: 2, kind: input, shape index: {}]   ;;  %s182_s0 = inlined_call_operand.vmem [shape: f32[8,48], index: 0, kind: input, shape index: {}]   ;;  %s183_s3 = inlined_call_operand.vmem [shape: f32[32,16], index: 3, kind: input, shape index: {}]   ;;  %s184_s4 = inlined_call_operand.vmem [shape: f32[1,16], index: 4, kind: input, shape index: {}]   ;;  %s185_s5 = inlined_call_operand.vmem [shape: f32[8,48], index: 5, kind: output, shape index: {}]  }
   0x1   :  { %v26_v0 = vld [vmem:[%s180_s1 + $0x28] sm:$0xff]  ;;  %v25_v1 = vld [vmem:[%s180_s1 + $0x20] sm:$0xff]  ;;  %v24_v2 = vld [vmem:[%s180_s1 + $0x18] sm:$0xff] }
   0x2   :  { %45 = vmatpush.msra.mxu0 %v26_v0  ;;  %v23_v3 = vld [vmem:[%s180_s1 + $0x10] sm:$0xff]  ;;  %v22_v4 = vld [vmem:[%s180_s1 + $0x8] sm:$0xff]  ;;  %v21_v5 = vld [vmem:[%s180_s1] sm:$0xff] }
   0x3   :  { %v20_v6 = vld [vmem:[%s182_s0] sm:$0xff]  ;;  %v59_v7 = vld [vmem:[%s183_s3 + $0x18] sm:$0xff]  ;;  %v58_v8 = vld [vmem:[%s183_s3 + $0x10] sm:$0xff] }
   0x4   :  { %46 = vmatpush.msra.mxu0 %v25_v1  ;;  %80 = vmatpush.msra.mxu1 %v59_v7  ;;  %v57_v9 = vld [vmem:[%s183_s3 + $0x8] sm:$0xff]  ;;  %v56_v10 = vld [vmem:[%s183_s3] sm:$0xff] }
   0x5   :  { %v101_v11 = vld [vmem:[%s181_s2] ss:$0 sm:$0xff] }
   0x6   :  { %47 = vmatpush.msra.mxu0 %v24_v2  ;;  %81 = vmatpush.msra.mxu1 %v58_v8  ;;  %v102_v15 = vld [vmem:[%s184_s4] ss:$0 sm:$0xff] }
   0x8   :  { %48 = vmatpush.msra.mxu0 %v23_v3  ;;  %82 = vmatpush.msra.mxu1 %v57_v9 }
   0xa   :  { %49 = vmatpush.msra.mxu0 %v22_v4  ;;  %83 = vmatpush.msra.mxu1 %v56_v10 }
   0xc   :  { %50 = vmatpush.msra.mxu0 %v21_v5 }
   0xd   :  { %98 = vmatmul.msk.f32.vlgmr.msra.gmra.mxu0 %vm31_vm0, %v20_v6 }
  0x8a   :  { %v52_v12 = vpop.f32.mrf.mxu0 }
  0x8b   :  { %v53_v13 = vadd.f32 %v101_v11, %v52_v12 }
  0x8d   :  { %103 = vtanh.f32 %v53_v13 }
  0x93   :  { %v104_v14 = vpop.eup %103 }
  0x94   :  { %99 = vmatmul.msk.f32.vlgmr.msra.gmra.mxu1 %vm64_vm1, %v104_v14  ;;  %88 = vrot.lane.b32.xlu0 %v104_v14, %s105_s15 }
 0x106   :  { %v89_v18 = vpop.permute.xlu0 %88 }
 0x111   :  { %v85_v16 = vpop.f32.mrf.mxu1 }
 0x112   :  { %v86_v17 = vadd.f32 %v102_v15, %v85_v16 }
 0x114   :  { %v92_v19 = vsel %vm91_vm2, %v86_v17, %v89_v18 }
 0x115   :  { %93 = vst.msk [vmem:[%s185_s5] sm:$0xff] %vm31_vm0, %v92_v19 }

</bundles_post_ra>
